<compile_context>
chip_gen: v5e
topology: v5e:2x2
jax: 0.10.0
libtpu: 0.0.40
codegen_flags: <defaults>
</compile_context>

<pallas_src>
import functools
import math

import jax
import jax.numpy as jnp
from jax.experimental import pallas as pl
from jax.experimental.pallas import tpu as pltpu

POS_DIM = 512          # fixed by the module (self.pos_dim = 512)
HALF = POS_DIM // 2
MAX_NODES = 8          # global `max_nodes` in the original script


# ----------------------------- Pallas kernel ------------------------------ #
def _net_kernel(pos_ref, div_ref, w1s_ref, w1c_ref, b1_ref,
                w2_ref, b2_ref, w3_ref, b3_ref, out_ref):
    # pos_ref : (block_m, 1)        masked node positions for this row block
    # div_ref : (1, HALF)           sinusoid frequencies (resident)
    # w1s/w1c : (HALF, h1)          hidden1 weight rows hit by sin / cos terms
    # w2/w3   : (h1, h2) / (h2, o)  remaining Linear weights (in, out) layout
    # b*      : (1, out)
    angles = pos_ref[...] * div_ref[...]                        # (block_m, HALF)
    s = jnp.sin(angles)                                         # EUP
    c = jnp.cos(angles)                                         # EUP
    # pe @ W1  ==  sin(angles) @ W1[0::2] + cos(angles) @ W1[1::2]
    h1 = jax.nn.sigmoid(
        jnp.dot(s, w1s_ref[...], preferred_element_type=jnp.float32)
        + jnp.dot(c, w1c_ref[...], preferred_element_type=jnp.float32)
        + b1_ref[...])
    h2 = jax.nn.sigmoid(
        jnp.dot(h1, w2_ref[...], preferred_element_type=jnp.float32)
        + b2_ref[...])
    out_ref[...] = (
        jnp.dot(h2, w3_ref[...], preferred_element_type=jnp.float32)
        + b3_ref[...])


# ------------------------- one-time param prep ----------------------------- #
def prepare_params(params):
    """Hoisted out of the forward wrapper: split hidden1's weight into the rows
    multiplied by sin (even pe columns) / cos (odd pe columns) and precompute
    the frequency table.  Call once per parameter set."""
    div_term = jnp.exp(
        jnp.arange(0, POS_DIM, 2, dtype=jnp.float32)
        * (-math.log(10000.0) / POS_DIM)).reshape(1, HALF)
    return {
        "div_term": div_term,
        "w1_sin": params["w1"][0::2, :],
        "w1_cos": params["w1"][1::2, :],
        "b1": params["b1"],
        "w2": params["w2"], "b2": params["b2"],
        "w3": params["w3"], "b3": params["b3"],
    }


def _round_up(x, m):
    return ((x + m - 1) // m) * m


# ------------------------------ wrapper ----------------------------------- #
@functools.partial(jax.jit, static_argnames=("max_nodes", "block_m"))
def net_forward(prep, node_num, node_position_start,
                max_nodes=MAX_NODES, block_m=None):
    batch = node_num.shape[0]
    n_h1 = prep["w1_sin"].shape[1]
    n_h2 = prep["w2"].shape[1]
    n_out = prep["w3"].shape[1]

    # glue: node mask + masked positions (cheap elementwise)
    node_mask = (jnp.arange(max_nodes, dtype=jnp.int32)[None, :]
                 < node_num[:, None].astype(jnp.int32))                 # (B, N)
    pos = node_position_start.astype(jnp.float32) * node_mask.astype(jnp.float32)

    M = batch * max_nodes
    if block_m is None:
        # <= 2048 rows/step: angles + sin + cos ~ 6 MiB f32 -> safe on v7x's
        # 64 MiB VMEM.  On v5e/v6e (128 MiB) pass block_m=4096..8192 for fewer
        # grid steps.
        block_m = min(2048, _round_up(M, 8))
    Mp = _round_up(M, block_m)

    pos2d = pos.reshape(M, 1)
    if Mp != M:
        pos2d = jnp.pad(pos2d, ((0, Mp - M), (0, 0)))   # pad rows: pos=0 is benign

    grid = (Mp // block_m,)
    resident = lambda i: (0, 0)     # same block every step -> stays VMEM-resident

    out = pl.pallas_call(
        _net_kernel,
        out_shape=jax.ShapeDtypeStruct((Mp, n_out), jnp.float32),
        grid=grid,
        in_specs=[
            pl.BlockSpec((block_m, 1), lambda i: (i, 0)),    # pos (streamed)
            pl.BlockSpec((1, HALF), resident),               # div_term
            pl.BlockSpec((HALF, n_h1), resident),            # w1_sin
            pl.BlockSpec((HALF, n_h1), resident),            # w1_cos
            pl.BlockSpec((1, n_h1), resident),               # b1
            pl.BlockSpec((n_h1, n_h2), resident),            # w2
            pl.BlockSpec((1, n_h2), resident),               # b2
            pl.BlockSpec((n_h2, n_out), resident),           # w3
            pl.BlockSpec((1, n_out), resident),              # b3
        ],
        out_specs=pl.BlockSpec((block_m, n_out), lambda i: (i, 0)),
        compiler_params=pltpu.CompilerParams(
            dimension_semantics=("parallel",),   # both TCs on v7x
            vmem_limit_bytes=32 * 1024 * 1024),
    )(pos2d, prep["div_term"], prep["w1_sin"], prep["w1_cos"], prep["b1"],
      prep["w2"], prep["b2"], prep["w3"], prep["b3"])

    return out[:M].reshape(batch, max_nodes, n_out)


# --------------------------- pure-JAX reference ---------------------------- #
def net_reference(params, node_num, node_position_start, max_nodes=MAX_NODES):
    batch = node_num.shape[0]
    node_mask = (jnp.arange(max_nodes, dtype=jnp.int32)[None, :]
                 < node_num[:, None].astype(jnp.int32))
    position = node_position_start.astype(jnp.float32)[..., None]
    position = position * node_mask[..., None].astype(jnp.float32)      # (B, N, 1)
    div_term = jnp.exp(jnp.arange(0, POS_DIM, 2, dtype=jnp.float32)
                       * (-math.log(10000.0) / POS_DIM))
    ang = position * div_term                                           # (B, N, 256)
    pe = jnp.zeros((batch, max_nodes, POS_DIM), jnp.float32)
    pe = pe.at[:, :, 0::2].set(jnp.sin(ang))
    pe = pe.at[:, :, 1::2].set(jnp.cos(ang))
    h1 = jax.nn.sigmoid(pe @ params["w1"] + params["b1"])
    h2 = jax.nn.sigmoid(h1 @ params["w2"] + params["b2"])
    return h2 @ params["w3"] + params["b3"]


# ------------------------------- params ------------------------------------ #
def init_params(key, n_input, n_hidden1, n_hidden2, n_output):
    """Deterministic PyTorch-Linear-style init; weights stored as (in, out)."""
    def linear(k, fan_in, fan_out):
        kw, kb = jax.random.split(k)
        bound = 1.0 / math.sqrt(fan_in)
        w = jax.random.uniform(kw, (fan_in, fan_out), jnp.float32, -bound, bound)
        b = jax.random.uniform(kb, (1, fan_out), jnp.float32, -bound, bound)
        return w, b

    k1, k2, k3 = jax.random.split(key, 3)
    w1, b1 = linear(k1, n_input, n_hidden1)
    w2, b2 = linear(k2, n_hidden1, n_hidden2)
    w3, b3 = linear(k3, n_hidden2, n_output)
    return {"w1": w1, "b1": b1, "w2": w2, "b2": b2, "w3": w3, "b3": b3}


if __name__ == "__main__":
    key = jax.random.PRNGKey(0)
    kp, kn, ks = jax.random.split(key, 3)

    batch = 2
    n_input, n_hidden1, n_hidden2, n_output = POS_DIM, 32, 32, 4
    params = init_params(kp, n_input, n_hidden1, n_hidden2, n_output)
    prep = prepare_params(params)          # one-time weight split / freq table

    node_num = jax.random.randint(kn, (batch,), 1, MAX_NODES + 1, dtype=jnp.int32)
    node_position_start = jax.random.uniform(
        ks, (batch, MAX_NODES), jnp.float32, 0.0, float(MAX_NODES))

    out = net_forward(prep, node_num, node_position_start)
    out = jax.block_until_ready(out)

    ref = net_reference(params, node_num, node_position_start)
    assert out.shape == (batch, MAX_NODES, n_output)
    assert jnp.allclose(out, ref, atol=1e-5, rtol=1e-5), "mismatch vs reference"

    print("KERNEL_OK")
</pallas_src>

<mosaic_0001>
module attributes {stable_mosaic.version = 11 : i64} {
  func.func @_net_kernel(%arg0: i32, %arg1: memref<16x1xf32, #tpu.memory_space<vmem>>, %arg2: memref<1x256xf32, #tpu.memory_space<vmem>>, %arg3: memref<256x32xf32, #tpu.memory_space<vmem>>, %arg4: memref<256x32xf32, #tpu.memory_space<vmem>>, %arg5: memref<1x32xf32, #tpu.memory_space<vmem>>, %arg6: memref<32x32xf32, #tpu.memory_space<vmem>>, %arg7: memref<1x32xf32, #tpu.memory_space<vmem>>, %arg8: memref<32x4xf32, #tpu.memory_space<vmem>>, %arg9: memref<1x4xf32, #tpu.memory_space<vmem>>, %arg10: memref<16x4xf32, #tpu.memory_space<vmem>>) attributes {dimension_semantics = [#tpu.dimension_semantics<parallel>], iteration_bounds = array<i64: 1>, scalar_prefetch = 0 : i64, scratch_operands = 0 : i64, tpu.core_type = #tpu.core_type<tc>, window_params = [{transform_indices = @transform_0, window_bounds = array<i64: 16, 1>}, {pipeline_mode = #tpu.pipeline_mode<synchronous>, transform_indices = @transform_1, window_bounds = array<i64: 1, 256>}, {pipeline_mode = #tpu.pipeline_mode<synchronous>, transform_indices = @transform_2, window_bounds = array<i64: 256, 32>}, {pipeline_mode = #tpu.pipeline_mode<synchronous>, transform_indices = @transform_3, window_bounds = array<i64: 256, 32>}, {pipeline_mode = #tpu.pipeline_mode<synchronous>, transform_indices = @transform_4, window_bounds = array<i64: 1, 32>}, {pipeline_mode = #tpu.pipeline_mode<synchronous>, transform_indices = @transform_5, window_bounds = array<i64: 32, 32>}, {pipeline_mode = #tpu.pipeline_mode<synchronous>, transform_indices = @transform_6, window_bounds = array<i64: 1, 32>}, {pipeline_mode = #tpu.pipeline_mode<synchronous>, transform_indices = @transform_7, window_bounds = array<i64: 32, 4>}, {pipeline_mode = #tpu.pipeline_mode<synchronous>, transform_indices = @transform_8, window_bounds = array<i64: 1, 4>}, {transform_indices = @transform_9, window_bounds = array<i64: 16, 4>}]} {
    %c0 = arith.constant 0 : index
    %c0_0 = arith.constant 0 : index
    %0 = vector.load %arg1[%c0, %c0_0] : memref<16x1xf32, #tpu.memory_space<vmem>>, vector<16x1xf32>
    %c0_1 = arith.constant 0 : index
    %c0_2 = arith.constant 0 : index
    %1 = vector.load %arg2[%c0_1, %c0_2] : memref<1x256xf32, #tpu.memory_space<vmem>>, vector<1x256xf32>
    %2 = vector.broadcast %0 : vector<16x1xf32> to vector<16x256xf32>
    %3 = vector.broadcast %1 : vector<1x256xf32> to vector<16x256xf32>
    %4 = arith.mulf %2, %3 : vector<16x256xf32>
    %5 = math.sin %4 : vector<16x256xf32>
    %6 = math.cos %4 : vector<16x256xf32>
    %c0_3 = arith.constant 0 : index
    %c0_4 = arith.constant 0 : index
    %7 = vector.load %arg3[%c0_3, %c0_4] : memref<256x32xf32, #tpu.memory_space<vmem>>, vector<256x32xf32>
    %cst = arith.constant dense<0.000000e+00> : vector<16x32xf32>
    %8 = tpu.matmul %5, %7, %cst {dimension_numbers = #tpu.dot_dimension_numbers<[1], [0], [0], [1], [0, 0, 1, 1], [], []>} : vector<16x256xf32>, vector<256x32xf32>, vector<16x32xf32> -> vector<16x32xf32>
    %c0_5 = arith.constant 0 : index
    %c0_6 = arith.constant 0 : index
    %9 = vector.load %arg4[%c0_5, %c0_6] : memref<256x32xf32, #tpu.memory_space<vmem>>, vector<256x32xf32>
    %cst_7 = arith.constant dense<0.000000e+00> : vector<16x32xf32>
    %10 = tpu.matmul %6, %9, %cst_7 {dimension_numbers = #tpu.dot_dimension_numbers<[1], [0], [0], [1], [0, 0, 1, 1], [], []>} : vector<16x256xf32>, vector<256x32xf32>, vector<16x32xf32> -> vector<16x32xf32>
    %11 = arith.addf %8, %10 : vector<16x32xf32>
    %c0_8 = arith.constant 0 : index
    %c0_9 = arith.constant 0 : index
    %12 = vector.load %arg5[%c0_8, %c0_9] : memref<1x32xf32, #tpu.memory_space<vmem>>, vector<1x32xf32>
    %13 = vector.broadcast %12 : vector<1x32xf32> to vector<16x32xf32>
    %14 = arith.addf %11, %13 : vector<16x32xf32>
    %15 = arith.negf %14 : vector<16x32xf32>
    %16 = math.exp %15 : vector<16x32xf32>
    %cst_10 = arith.constant 1.000000e+00 : f32
    %17 = vector.broadcast %cst_10 : f32 to vector<16x32xf32>
    %18 = arith.addf %17, %16 : vector<16x32xf32>
    %19 = arith.divf %17, %18 : vector<16x32xf32>
    %c0_11 = arith.constant 0 : index
    %c0_12 = arith.constant 0 : index
    %20 = vector.load %arg6[%c0_11, %c0_12] : memref<32x32xf32, #tpu.memory_space<vmem>>, vector<32x32xf32>
    %cst_13 = arith.constant dense<0.000000e+00> : vector<16x32xf32>
    %21 = tpu.matmul %19, %20, %cst_13 {dimension_numbers = #tpu.dot_dimension_numbers<[1], [0], [0], [1], [0, 0, 1, 1], [], []>} : vector<16x32xf32>, vector<32x32xf32>, vector<16x32xf32> -> vector<16x32xf32>
    %c0_14 = arith.constant 0 : index
    %c0_15 = arith.constant 0 : index
    %22 = vector.load %arg7[%c0_14, %c0_15] : memref<1x32xf32, #tpu.memory_space<vmem>>, vector<1x32xf32>
    %23 = vector.broadcast %22 : vector<1x32xf32> to vector<16x32xf32>
    %24 = arith.addf %21, %23 : vector<16x32xf32>
    %25 = arith.negf %24 : vector<16x32xf32>
    %26 = math.exp %25 : vector<16x32xf32>
    %cst_16 = arith.constant 1.000000e+00 : f32
    %27 = vector.broadcast %cst_16 : f32 to vector<16x32xf32>
    %28 = arith.addf %27, %26 : vector<16x32xf32>
    %29 = arith.divf %27, %28 : vector<16x32xf32>
    %c0_17 = arith.constant 0 : index
    %c0_18 = arith.constant 0 : index
    %30 = vector.load %arg8[%c0_17, %c0_18] : memref<32x4xf32, #tpu.memory_space<vmem>>, vector<32x4xf32>
    %cst_19 = arith.constant dense<0.000000e+00> : vector<16x4xf32>
    %31 = tpu.matmul %29, %30, %cst_19 {dimension_numbers = #tpu.dot_dimension_numbers<[1], [0], [0], [1], [0, 0, 1, 1], [], []>} : vector<16x32xf32>, vector<32x4xf32>, vector<16x4xf32> -> vector<16x4xf32>
    %c0_20 = arith.constant 0 : index
    %c0_21 = arith.constant 0 : index
    %32 = vector.load %arg9[%c0_20, %c0_21] : memref<1x4xf32, #tpu.memory_space<vmem>>, vector<1x4xf32>
    %33 = vector.broadcast %32 : vector<1x4xf32> to vector<16x4xf32>
    %34 = arith.addf %31, %33 : vector<16x4xf32>
    %c0_22 = arith.constant 0 : index
    %c0_23 = arith.constant 0 : index
    %35 = vector.load %arg10[%c0_22, %c0_23] : memref<16x4xf32, #tpu.memory_space<vmem>>, vector<16x4xf32>
    tpu.vector_store %arg10[%c0_22, %c0_23], %34 {strides = array<i32>} : memref<16x4xf32, #tpu.memory_space<vmem>>, vector<16x4xf32>,
    return
  }
  func.func @transform_0(%arg0: i32) -> (i32, i32) {
    %c0_i32 = arith.constant 0 : i32
    %c0_i32_0 = arith.constant 0 : i32
    return %arg0, %c0_i32 : i32, i32
  }
  func.func @transform_1(%arg0: i32) -> (i32, i32) {
    %c0_i32 = arith.constant 0 : i32
    %c0_i32_0 = arith.constant 0 : i32
    %c0_i32_1 = arith.constant 0 : i32
    return %c0_i32, %c0_i32_0 : i32, i32
  }
  func.func @transform_2(%arg0: i32) -> (i32, i32) {
    %c0_i32 = arith.constant 0 : i32
    %c0_i32_0 = arith.constant 0 : i32
    %c0_i32_1 = arith.constant 0 : i32
    return %c0_i32, %c0_i32_0 : i32, i32
  }
  func.func @transform_3(%arg0: i32) -> (i32, i32) {
    %c0_i32 = arith.constant 0 : i32
    %c0_i32_0 = arith.constant 0 : i32
    %c0_i32_1 = arith.constant 0 : i32
    return %c0_i32, %c0_i32_0 : i32, i32
  }
  func.func @transform_4(%arg0: i32) -> (i32, i32) {
    %c0_i32 = arith.constant 0 : i32
    %c0_i32_0 = arith.constant 0 : i32
    %c0_i32_1 = arith.constant 0 : i32
    return %c0_i32, %c0_i32_0 : i32, i32
  }
  func.func @transform_5(%arg0: i32) -> (i32, i32) {
    %c0_i32 = arith.constant 0 : i32
    %c0_i32_0 = arith.constant 0 : i32
    %c0_i32_1 = arith.constant 0 : i32
    return %c0_i32, %c0_i32_0 : i32, i32
  }
  func.func @transform_6(%arg0: i32) -> (i32, i32) {
    %c0_i32 = arith.constant 0 : i32
    %c0_i32_0 = arith.constant 0 : i32
    %c0_i32_1 = arith.constant 0 : i32
    return %c0_i32, %c0_i32_0 : i32, i32
  }
  func.func @transform_7(%arg0: i32) -> (i32, i32) {
    %c0_i32 = arith.constant 0 : i32
    %c0_i32_0 = arith.constant 0 : i32
    %c0_i32_1 = arith.constant 0 : i32
    return %c0_i32, %c0_i32_0 : i32, i32
  }
  func.func @transform_8(%arg0: i32) -> (i32, i32) {
    %c0_i32 = arith.constant 0 : i32
    %c0_i32_0 = arith.constant 0 : i32
    %c0_i32_1 = arith.constant 0 : i32
    return %c0_i32, %c0_i32_0 : i32, i32
  }
  func.func @transform_9(%arg0: i32) -> (i32, i32) {
    %c0_i32 = arith.constant 0 : i32
    %c0_i32_0 = arith.constant 0 : i32
    return %arg0, %c0_i32 : i32, i32
  }
}

</mosaic_0001>

<bundles_post_ra>
// kernel: net_forward.1
= control target key start
LH: loop header
LB: loop body
LE: loop exit
PB: predicated region body
PF: predicated region fallthrough
CT: control target
= control target key end

     0   :  { %v1677_v0 = vmov 0   ;;  %s2516_s0 = inlined_call_operand.vmem [shape: f32[16,1], index: 0, kind: input, shape index: {}]   ;;  %s2517_s1 = inlined_call_operand.vmem [shape: f32[1,256], index: 1, kind: input, shape index: {}]   ;;  %s2518_s3 = inlined_call_operand.vmem [shape: f32[256,32], index: 3, kind: input, shape index: {}]   ;;  %s2519_s2 = inlined_call_operand.vmem [shape: f32[256,32], index: 2, kind: input, shape index: {}]   ;;  %s2520_s4 = inlined_call_operand.vmem [shape: f32[1,32], index: 4, kind: input, shape index: {}]   ;;  %s2521_s6 = inlined_call_operand.vmem [shape: f32[1,32], index: 6, kind: input, shape index: {}]   ;;  %s2522_s5 = inlined_call_operand.vmem [shape: f32[32,32], index: 5, kind: input, shape index: {}]   ;;  %s2523_s8 = inlined_call_operand.vmem [shape: f32[1,4], index: 8, kind: input, shape index: {}]   ;;  %s2524_s7 = inlined_call_operand.vmem [shape: f32[32,4], index: 7, kind: input, shape index: {}]   ;;  %s2525_s9 = inlined_call_operand.vmem [shape: f32[16,4], index: 9, kind: output, shape index: {}]  }
   0x1   :  { %1657 = vset.pattern.permute.xlu0 %v1677_v0  ;;  %v32_v1 = vld [vmem:[%s2516_s0] sm:$0xff]  ;;  %v33_v2 = vld [vmem:[%s2516_s0 + $0x8] sm:$0xff]  ;;  %v1337_v7 = vld [vmem:[%s2518_s3 + $0x78] sm:$0xff] }
   0x2   :  { %37 = vperm.xlu0 %1657, %v32_v1   ;;  %v34_v3 = vld [vmem:[%s2517_s1] sm:$0x3]  ;;  %v1353_v8 = vld [vmem:[%s2518_s3 + $0xf8] sm:$0xff]  ;;  %1354 = vmatpush.msra.mxu0 %v1337_v7  ;;  %v1336_v13 = vld [vmem:[%s2518_s3 + $0x70] sm:$0xff] }
   0x3   :  { %v46_v4 = vperm.slane %v34_v3, 0  ;;  %v47_v5 = vperm.slane %v34_v3, 1  ;;  %v1305_v9 = vld [vmem:[%s2519_s2 + $0x78] sm:$0xff]  ;;  %1377 = vmatpush.msra.mxu1 %v1353_v8  ;;  %v1352_v14 = vld [vmem:[%s2518_s3 + $0xf0] sm:$0xff]  ;;  %v1335_v17 = vld [vmem:[%s2518_s3 + $0x68] sm:$0xff] }
   0x4   :  { %v1321_v12 = vld [vmem:[%s2519_s2 + $0xf8] sm:$0xff]  ;;  %1400 = vmatpush.msra.mxu2 %v1305_v9  ;;  %v1304_v15 = vld [vmem:[%s2519_s2 + $0x70] sm:$0xff]  ;;  %1355 = vmatpush.msra.mxu0 %v1336_v13  ;;  %v1351_v20 = vld [vmem:[%s2518_s3 + $0xe8] sm:$0xff] }
   0x5   :  { %1423 = vmatpush.msra.mxu3 %v1321_v12  ;;  %v1320_v16 = vld [vmem:[%s2519_s2 + $0xf0] sm:$0xff]  ;;  %1378 = vmatpush.msra.mxu1 %v1352_v14  ;;  %v1303_v21 = vld [vmem:[%s2519_s2 + $0x68] sm:$0xff]  ;;  %v1334_v23 = vld [vmem:[%s2518_s3 + $0x60] sm:$0xff] }
   0x6   :  { %v1319_v22 = vld [vmem:[%s2519_s2 + $0xe8] sm:$0xff]  ;;  %1401 = vmatpush.msra.mxu2 %v1304_v15  ;;  %v1350_v24 = vld [vmem:[%s2518_s3 + $0xe0] sm:$0xff]  ;;  %1356 = vmatpush.msra.mxu0 %v1335_v17  ;;  %v1333_v29 = vld [vmem:[%s2518_s3 + $0x58] sm:$0xff] }
   0x7   :  { %1424 = vmatpush.msra.mxu3 %v1320_v16  ;;  %1379 = vmatpush.msra.mxu1 %v1351_v20  ;;  %v1302_v27 = vld [vmem:[%s2519_s2 + $0x60] sm:$0xff]  ;;  %v1349_v30 = vld [vmem:[%s2518_s3 + $0xd8] sm:$0xff]  ;;  %v1332_v36 = vld [vmem:[%s2518_s3 + $0x50] sm:$0xff] }
   0x8   :  { %v1318_v28 = vld [vmem:[%s2519_s2 + $0xe0] sm:$0xff]  ;;  %1402 = vmatpush.msra.mxu2 %v1303_v21  ;;  %1357 = vmatpush.msra.mxu0 %v1334_v23  ;;  %v1301_v33 = vld [vmem:[%s2519_s2 + $0x58] sm:$0xff]  ;;  %v1348_v37 = vld [vmem:[%s2518_s3 + $0xd0] sm:$0xff] }
   0x9   :  { %1425 = vmatpush.msra.mxu3 %v1319_v22  ;;  %1380 = vmatpush.msra.mxu1 %v1350_v24  ;;  %v1317_v34 = vld [vmem:[%s2519_s2 + $0xd8] sm:$0xff]  ;;  %v1300_v41 = vld [vmem:[%s2519_s2 + $0x50] sm:$0xff]  ;;  %v1331_v45 = vld [vmem:[%s2518_s3 + $0x48] sm:$0xff] }
   0xa   :  { %42 = vperm.xlu0 %1657, %v33_v2   ;;  %1403 = vmatpush.msra.mxu2 %v1302_v27  ;;  %v1316_v42 = vld [vmem:[%s2519_s2 + $0xd0] sm:$0xff]  ;;  %v1347_v46 = vld [vmem:[%s2518_s3 + $0xc8] sm:$0xff]  ;;  %v1330_v51 = vld [vmem:[%s2518_s3 + $0x40] sm:$0xff] }
   0xb   :  { %1426 = vmatpush.msra.mxu3 %v1318_v28  ;;  %1358 = vmatpush.msra.mxu0 %v1333_v29  ;;  %v1299_v48 = vld [vmem:[%s2519_s2 + $0x48] sm:$0xff]  ;;  %v1346_v52 = vld [vmem:[%s2518_s3 + $0xc0] sm:$0xff]  ;;  %v1329_v60 = vld [vmem:[%s2518_s3 + $0x38] sm:$0xff] }
   0xc   :  { %1381 = vmatpush.msra.mxu1 %v1349_v30  ;;  %1404 = vmatpush.msra.mxu2 %v1301_v33  ;;  %v1315_v49 = vld [vmem:[%s2519_s2 + $0xc8] sm:$0xff]  ;;  %v1298_v54 = vld [vmem:[%s2519_s2 + $0x40] sm:$0xff]  ;;  %v1345_v61 = vld [vmem:[%s2518_s3 + $0xb8] sm:$0xff]  ;;  %v1679_v30 = vmov 2102212464  }
   0xd   :  { %1427 = vmatpush.msra.mxu3 %v1317_v34  ;;  %1359 = vmatpush.msra.mxu0 %v1332_v36  ;;  %v1314_v55 = vld [vmem:[%s2519_s2 + $0xc0] sm:$0xff]  ;;  %v1297_v62 = vld [vmem:[%s2519_s2 + $0x38] sm:$0xff]  ;;  %v1328_v1 = vld [vmem:[%s2518_s3 + $0x30] sm:$0xff] }
   0xe   :  { %1382 = vmatpush.msra.mxu1 %v1348_v37  ;;  %1405 = vmatpush.msra.mxu2 %v1300_v41  ;;  %v1313_v63 = vld [vmem:[%s2519_s2 + $0xb8] sm:$0xff]  ;;  %v1344_v2 = vld [vmem:[%s2518_s3 + $0xb0] sm:$0xff]  ;;  %v1327_v9 = vld [vmem:[%s2518_s3 + $0x28] sm:$0xff] }
   0xf   :  { %1428 = vmatpush.msra.mxu3 %v1316_v42  ;;  %1360 = vmatpush.msra.mxu0 %v1331_v45  ;;  %v1312_v7 = vld [vmem:[%s2519_s2 + $0xb0] sm:$0xff]  ;;  %v1343_v12 = vld [vmem:[%s2518_s3 + $0xa8] sm:$0xff]  ;;  %v1326_v17 = vld [vmem:[%s2518_s3 + $0x20] sm:$0xff]  ;;  %v1681_v45 = vmov 2475754826  }
  0x10   :  { %1383 = vmatpush.msra.mxu1 %v1347_v46  ;;  %1406 = vmatpush.msra.mxu2 %v1299_v48  ;;  %v1295_v15 = vld [vmem:[%s2519_s2 + $0x28] sm:$0xff]  ;;  %v1294_v22 = vld [vmem:[%s2519_s2 + $0x20] sm:$0xff]  ;;  %v1325_v27 = vld [vmem:[%s2518_s3 + $0x18] sm:$0xff] }
  0x11   :  { %1429 = vmatpush.msra.mxu3 %v1315_v49  ;;  %1361 = vmatpush.msra.mxu0 %v1330_v51  ;;  %v1311_v16 = vld [vmem:[%s2519_s2 + $0xa8] sm:$0xff]  ;;  %v1310_v23 = vld [vmem:[%s2519_s2 + $0xa0] sm:$0xff]  ;;  %v1341_v28 = vld [vmem:[%s2518_s3 + $0x98] sm:$0xff] }
  0x12   :  { %1384 = vmatpush.msra.mxu1 %v1346_v52  ;;  %1407 = vmatpush.msra.mxu2 %v1298_v54  ;;  %v1293_v36 = vld [vmem:[%s2519_s2 + $0x18] sm:$0xff]  ;;  %v1324_v41 = vld [vmem:[%s2518_s3 + $0x10] sm:$0xff] }
  0x13   :  { %1430 = vmatpush.msra.mxu3 %v1314_v55  ;;  %1362 = vmatpush.msra.mxu0 %v1329_v60  ;;  %v1309_v37 = vld [vmem:[%s2519_s2 + $0x98] sm:$0xff]  ;;  %v1340_v42 = vld [vmem:[%s2518_s3 + $0x90] sm:$0xff]  ;;  %v1683_v60 = vmov 683565275  }
  0x14   :  { %1385 = vmatpush.msra.mxu1 %v1345_v61  ;;  %1408 = vmatpush.msra.mxu2 %v1297_v62  ;;  %v1292_v54 = vld [vmem:[%s2519_s2 + $0x10] sm:$0xff] }
  0x15   :  { %1431 = vmatpush.msra.mxu3 %v1313_v63  ;;  %1363 = vmatpush.msra.mxu0 %v1328_v1  ;;  %v1308_v55 = vld [vmem:[%s2519_s2 + $0x90] sm:$0xff] }
  0x16   :  { %1386 = vmatpush.msra.mxu1 %v1344_v2 }
  0x17   :  { %1432 = vmatpush.msra.mxu3 %v1312_v7  ;;  %1364 = vmatpush.msra.mxu0 %v1327_v9  ;;  %v1322_v9 = vld [vmem:[%s2518_s3] sm:$0xff] }
  0x18   :  { %1387 = vmatpush.msra.mxu1 %v1343_v12  ;;  %v1338_v12 = vld [vmem:[%s2518_s3 + $0x80] sm:$0xff] }
  0x19   :  { %1433 = vmatpush.msra.mxu3 %v1311_v16  ;;  %1365 = vmatpush.msra.mxu0 %v1326_v17  ;;  %v1290_v17 = vld [vmem:[%s2519_s2] sm:$0xff] }
  0x1b   :  { %1434 = vmatpush.msra.mxu3 %v1310_v23  ;;  %1366 = vmatpush.msra.mxu0 %v1325_v27 }
  0x1d   :  { %1435 = vmatpush.msra.mxu3 %v1309_v37  ;;  %1367 = vmatpush.msra.mxu0 %v1324_v41 }
  0x1f   :  { %1436 = vmatpush.msra.mxu3 %v1308_v55 }
  0x74   :  { %v38_v6 = vpop.permute.xlu0 %37 }
  0x75   :  { %v1753_v10 = vmul.f32 %v46_v4, %v38_v6  ;;  %v1755_v11 = vmul.f32 %v47_v5, %v38_v6  ;;  %v1296_v6 = vld [vmem:[%s2519_s2 + $0x30] sm:$0xff] }
  0x76   :  { %1409 = vmatpush.msra.mxu2 %v1296_v6  ;;  %v1307_v6 = vld [vmem:[%s2519_s2 + $0x88] sm:$0xff] }
  0x77   :  { %v57_v18 = vand.u32 2139095040, %v1753_v10  ;;  %v212_v19 = vand.u32 2139095040, %v1755_v11  ;;  %v54_v43 = vand.u32 2147483647, %v1753_v10  ;;  %v209_v24 = vand.u32 2147483647, %v1755_v11  ;;  %1437 = vmatpush.msra.mxu3 %v1307_v6 }
  0x78   :  { %1410 = vmatpush.msra.mxu2 %v1295_v15 }
  0x79   :  { %v58_v25 = vshrl.u32 %v57_v18, 23  ;;  %v213_v26 = vshrl.u32 %v212_v19, 23  ;;  %v61_v56 = vand.u32 8388607, %v54_v43  ;;  %v1342_v18 = vld [vmem:[%s2518_s3 + $0xa0] sm:$0xff] }
  0x7a   :  { %v1678_v19 = vmov 1326507024   ;;  %1388 = vmatpush.msra.mxu1 %v1342_v18  ;;  %1411 = vmatpush.msra.mxu2 %v1294_v22  ;;  %v1306_v18 = vld [vmem:[%s2519_s2 + $0x80] sm:$0xff]  ;;  %v2058_v37 = vand.u32 8388607, %v209_v24 }
  0x7b   :  { %v1610_v31 = vadd.s32 4294967169, %v58_v25  ;;  %v1613_v32 = vadd.s32 4294967169, %v213_v26  ;;  %v62_v13 = vor.u32 8388608, %v61_v56  ;;  %1438 = vmatpush.msra.mxu3 %v1306_v18 }
  0x7c   :  { %v43_v35 = vpop.permute.xlu0 %42  ;;  %1389 = vmatpush.msra.mxu1 %v1341_v28  ;;  %1412 = vmatpush.msra.mxu2 %v1293_v36 }
  0x7d   :  { %v64_v38 = vadd.s32 1, %v1610_v31  ;;  %v219_v39 = vadd.s32 1, %v1613_v32  ;;  %v1816_v40 = vmul.f32 %v47_v5, %v43_v35  ;;  %v1825_v44 = vmul.f32 %v46_v4, %v43_v35 }
  0x7e   :  { %v1933_v29 = vshll.u32 %v62_v13, 8  ;;  %v1680_v32 = vmov 920167782   ;;  %1390 = vmatpush.msra.mxu1 %v1340_v42  ;;  %1413 = vmatpush.msra.mxu2 %v1292_v54 }
  0x7f   :  { %vm65_vm0 = vcmp.gt.s32.totalorder %v64_v38, 0  ;;  %vm220_vm1 = vcmp.gt.s32.totalorder %v219_v39, 0  ;;  %v522_v47 = vand.u32 2139095040, %v1816_v40  ;;  %v367_v58 = vand.u32 2139095040, %v1825_v44 }
  0x80   :  { %v1840_v50 = vsel %vm65_vm0, %v64_v38, 0  ;;  %v1860_v57 = vsel %vm220_vm1, %v219_v39, 0  ;;  %v2007_v7 = vand.u32 65535, %v1933_v29  ;;  %v104_v36 = vshrl.u32 %v1933_v29, 16 }
  0x81   :  { %v1849_v53 = vand.u32 31, %v1840_v50  ;;  %v523_v59 = vshrl.u32 %v522_v47, 23  ;;  %v1885_v4 = vand.u32 31, %v1860_v57  ;;  %v368_v8 = vshrl.u32 %v367_v58, 23  ;;  %v1323_v58 = vld [vmem:[%s2518_s3 + $0x8] sm:$0xff] }
  0x82   :  { %v1951_v38 = vshrl.u32 %v1840_v50, 5  ;;  %v1682_v47 = vmov 2131351028   ;;  %v1967_v50 = vshrl.u32 %v1860_v57, 5  ;;  %1368 = vmatpush.msra.mxu0 %v1323_v58 }
  0x83   :  { %v1882_v3 = vsub.s32 32, %v1849_v53  ;;  %v1619_v5 = vadd.s32 4294967169, %v523_v59  ;;  %v1916_v21 = vsub.s32 32, %v1885_v4  ;;  %v1616_v25 = vadd.s32 4294967169, %v368_v8  ;;  %v1339_v59 = vld [vmem:[%s2518_s3 + $0x88] sm:$0xff] }
  0x84   :  { %v80_v31 = vshll.u32 %v1679_v30, %v1849_v53  ;;  %v83_v34 = vshll.u32 %v1680_v32, %v1849_v53  ;;  %v235_v39 = vshll.u32 %v1679_v30, %v1885_v4  ;;  %v1973_v52 = vshll.u32 %v1680_v32, %v1885_v4  ;;  %1391 = vmatpush.msra.mxu1 %v1339_v59 }
  0x85   :  { %v529_v14 = vadd.s32 1, %v1619_v5  ;;  %v1913_v20 = vshrl.u32 %v1678_v19, %v1882_v3  ;;  %v81_v33 = vshrl.u32 %v1680_v32, %v1882_v3  ;;  %v72_v46 = vshrl.u32 %v1681_v45, %v1882_v3  ;;  %v1291_v5 = vld [vmem:[%s2519_s2 + $0x8] sm:$0xff]  ;;  %1369 = vmatpush.msra.mxu0 %v1322_v9 }
  0x86   :  { %v75_v48 = vshrl.u32 %v1682_v47, %v1882_v3  ;;  %v236_v51 = vshrl.u32 %v1680_v32, %v1916_v21  ;;  %v374_v56 = vadd.s32 1, %v1616_v25  ;;  %v71_v61 = vshll.u32 %v1683_v60, %v1849_v53  ;;  %1414 = vmatpush.msra.mxu2 %v1291_v5  ;;  %1392 = vmatpush.msra.mxu1 %v1338_v12 }
  0x87   :  { %vm530_vm2 = vcmp.gt.s32.totalorder %v529_v14, 0  ;;  %v85_v49 = vor.u32 %v1913_v20, %v83_v34  ;;  %v74_v62 = vshll.u32 %v1681_v45, %v1849_v53  ;;  %v82_v63 = vor.u32 %v81_v33, %v80_v31 }
  0x88   :  { %v1925_v26 = vsel %vm530_vm2, %v529_v14, 0  ;;  %v239_v1 = vshrl.u32 %v1678_v19, %v1916_v21  ;;  %vm89_vm3 = vcmp.lt.s32.totalorder %v1951_v38, 4  ;;  %v73_v13 = vor.u32 %v72_v46, %v71_v61  ;;  %1415 = vmatpush.msra.mxu2 %v1290_v17 }
  0x89   :  { %v1942_v35 = vand.u32 31, %v1925_v26  ;;  %v76_v14 = vor.u32 %v75_v48, %v74_v62  ;;  %v99_v15 = vsel %vm89_vm3, %v85_v49, 1326507024  ;;  %v2022_v16 = vor.u32 %v236_v51, %v235_v39 }
  0x8a   :  { %vm244_vm4 = vcmp.lt.s32.totalorder %v1967_v50, 4  ;;  %v70_v20 = vshrl.u32 %v1683_v60, %v1882_v3  ;;  %vm375_vm5 = vcmp.gt.s32.totalorder %v374_v56, 0  ;;  %v77_v23 = vshll.u32 %v1682_v47, %v1849_v53 }
  0x8b   :  { %v1982_v57 = vsub.s32 32, %v1942_v35  ;;  %v1998_v2 = vshll.u32 %v1680_v32, %v1942_v35  ;;  %v78_v25 = vshrl.u32 %v1679_v30, %v1882_v3  ;;  %v95_v27 = vsel %vm89_vm3, %v82_v63, 920167782 }
  0x8c   :  { %v240_v28 = vor.u32 %v239_v1, %v1973_v52  ;;  %vm86_vm6 = vcmp.lt.s32.totalorder %v1951_v38, 1  ;;  %vm88_vm7 = vcmp.lt.s32.totalorder %v1951_v38, 3  ;;  %vm87_vm8 = vcmp.lt.s32.totalorder %v1951_v38, 2 }
  0x8d   :  { %v2012_v8 = vshrl.u32 %v1678_v19, %v1982_v57  ;;  %v79_v31 = vor.u32 %v78_v25, %v77_v23  ;;  %v94_v53 = vsel %vm86_vm6, %v73_v13, %v76_v14  ;;  %v100_v3 = vsel %vm88_vm7, %v82_v63, %v99_v15 }
  0x8e   :  { %v250_v33 = vsel %vm244_vm4, %v2022_v16, 920167782  ;;  %v2053_v34 = vsel %vm375_vm5, %v374_v56, 0  ;;  %v227_v46 = vshrl.u32 %v1681_v45, %v1916_v21  ;;  %v90_v48 = vsel %vm86_vm6, %v70_v20, %v73_v13 }
  0x8f   :  { %v550_v22 = vor.u32 %v2012_v8, %v1998_v2  ;;  %v91_v39 = vsel %vm89_vm3, %v79_v31, 2102212464  ;;  %v96_v41 = vsel %vm88_vm7, %v79_v31, %v95_v27  ;;  %v98_v42 = vsel %vm86_vm6, %v76_v14, %v79_v31 }
  0x90   :  { %v97_v49 = vsel %vm87_vm8, %v94_v53, %v96_v41  ;;  %v101_v51 = vsel %vm87_vm8, %v98_v42, %v100_v3  ;;  %v226_v52 = vshll.u32 %v1683_v60, %v1885_v4  ;;  %v92_v54 = vsel %vm88_vm7, %v76_v14, %v91_v39 }
  0x91   :  { %v105_v55 = vand.u32 65535, %v101_v51  ;;  %v106_v56 = vshrl.u32 %v101_v51, 16  ;;  %v127_v58 = vand.u32 65535, %v97_v49  ;;  %v254_v59 = vsel %vm244_vm4, %v240_v28, 1326507024 }
  0x92   :  { %v2081_v61 = vand.u32 31, %v2053_v34  ;;  %v128_v62 = vshrl.u32 %v97_v49, 16  ;;  %v217_v63 = vor.u32 8388608, %v2058_v37  ;;  %v2085_v6 = vor.u32 %v227_v46, %v226_v52 }
  0x93   :  { %v108_v1 = vmul.u32 %v106_v56, %v2007_v7  ;;  %v109_v5 = vmul.u32 %v105_v55, %v104_v36  ;;  %v229_v9 = vshll.u32 %v1681_v45, %v1885_v4  ;;  %vm241_vm9 = vcmp.lt.s32.totalorder %v1967_v50, 1 }
  0x94   :  { %v2092_v12 = vsel %vm87_vm8, %v90_v48, %v92_v54  ;;  %v130_v13 = vmul.u32 %v128_v62, %v2007_v7  ;;  %v131_v14 = vmul.u32 %v127_v58, %v104_v36  ;;  %v230_v15 = vshrl.u32 %v1682_v47, %v1916_v21 }
  0x95   :  { %v107_v17 = vmul.u32 %v105_v55, %v2007_v7  ;;  %v110_v18 = vmul.u32 %v106_v56, %v104_v36  ;;  %v111_v20 = vshll.u32 %v108_v1, 16  ;;  %v232_v23 = vshll.u32 %v1682_v47, %v1885_v4 }
  0x96   :  { %v113_v25 = vshll.u32 %v109_v5, 16  ;;  %v129_v27 = vmul.u32 %v127_v58, %v2007_v7  ;;  %v132_v28 = vmul.u32 %v128_v62, %v104_v36  ;;  %v133_v38 = vshll.u32 %v130_v13, 16 }
  0x97   :  { %vm115_vm10 = vc.u32 %v107_v17, %v111_v20  ;;  %v117_v31 = vadd.s32 %v111_v20, %v107_v17  ;;  %v135_v53 = vshll.u32 %v131_v14, 16  ;;  %v233_v3 = vshrl.u32 %v1679_v30, %v1916_v21 }
  0x98   :  { %v116_v37 = vsel %vm115_vm10, 1, %v1677_v0  ;;  %vm137_vm11 = vc.u32 %v129_v27, %v133_v38  ;;  %v139_v39 = vadd.s32 %v133_v38, %v129_v27  ;;  %v2104_v41 = vor.u32 %v230_v15, %v229_v9 }
  0x99   :  { %v118_v42 = vadd.s32 %v116_v37, %v110_v18  ;;  %vm119_vm12 = vc.u32 %v117_v31, %v113_v25  ;;  %v138_v4 = vsel %vm137_vm11, 1, %v1677_v0  ;;  %v2107_v46 = vor.u32 %v233_v3, %v232_v23 }
  0x9a   :  { %v112_v7 = vshrl.u32 %v108_v1, 16  ;;  %v120_v36 = vsel %vm119_vm12, 1, %v1677_v0  ;;  %v140_v48 = vadd.s32 %v138_v4, %v132_v28  ;;  %vm141_vm13 = vc.u32 %v139_v39, %v135_v53 }
  0x9b   :  { %v122_v49 = vadd.s32 %v120_v36, %v118_v42  ;;  %v134_v51 = vshrl.u32 %v130_v13, 16  ;;  %v142_v52 = vsel %vm141_vm13, 1, %v1677_v0  ;;  %vm243_vm14 = vcmp.lt.s32.totalorder %v1967_v50, 3 }
  0x9c   :  { %v144_v54 = vadd.s32 %v142_v52, %v140_v48  ;;  %vm242_vm15 = vcmp.lt.s32.totalorder %v1967_v50, 2  ;;  %v249_v55 = vsel %vm241_vm9, %v2085_v6, %v2104_v41  ;;  %v251_v56 = vsel %vm243_vm14, %v2107_v46, %v250_v33 }
  0x9d   :  { %v114_v58 = vshrl.u32 %v109_v5, 16  ;;  %v123_v62 = vadd.s32 %v122_v49, %v112_v7  ;;  %v252_v1 = vsel %vm242_vm15, %v249_v55, %v251_v56  ;;  %v253_v9 = vsel %vm241_vm9, %v2104_v41, %v2107_v46 }
  0x9e   :  { %v136_v13 = vshrl.u32 %v131_v14, 16  ;;  %v145_v15 = vadd.s32 %v144_v54, %v134_v51  ;;  %v255_v17 = vsel %vm243_vm14, %v2022_v16, %v254_v59  ;;  %v2129_v18 = vshll.u32 %v217_v63, 8 }
  0x9f   :  { %v2131_v20 = vadd.s32 %v123_v62, %v114_v58  ;;  %v2133_v33 = vadd.s32 %v139_v39, %v135_v53  ;;  %v256_v5 = vsel %vm242_vm15, %v253_v9, %v255_v17  ;;  %v283_v23 = vshrl.u32 %v252_v1, 16 }
  0xa0   :  { %v146_v25 = vadd.s32 %v145_v15, %v136_v13  ;;  %v259_v27 = vshrl.u32 %v2129_v18, 16  ;;  %v260_v28 = vand.u32 65535, %v256_v5  ;;  %v282_v14 = vand.u32 65535, %v252_v1 }
  0xa1   :  { %v2139_v38 = vshrl.u32 %v2053_v34, 5  ;;  %vm149_vm0 = vc.u32 %v2131_v20, %v2133_v33  ;;  %v258_v16 = vand.u32 65535, %v2129_v18  ;;  %v261_v59 = vshrl.u32 %v256_v5, 16 }
  0xa2   :  { %v2145_v63 = vsub.s32 32, %v2081_v61  ;;  %v2148_v31 = vshrl.u32 %v1925_v26, 5  ;;  %v150_v53 = vadd.s32 1, %v146_v25  ;;  %v264_v3 = vmul.u32 %v260_v28, %v259_v27 }
  0xa3   :  { %v390_v37 = vshll.u32 %v1679_v30, %v2081_v61  ;;  %v147_v34 = vmul.u32 %v1933_v29, %v2092_v12  ;;  %v263_v39 = vmul.u32 %v261_v59, %v258_v16  ;;  %v285_v42 = vmul.u32 %v283_v23, %v258_v16 }
  0xa4   :  { %v2156_v4 = vshll.u32 %v1680_v32, %v2081_v61  ;;  %v151_v7 = vsel %vm149_vm0, %v150_v53, %v146_v25  ;;  %v262_v36 = vmul.u32 %v260_v28, %v258_v16  ;;  %v286_v48 = vmul.u32 %v282_v14, %v259_v27 }
  0xa5   :  { %v152_v49 = vadd.s32 %v151_v7, %v147_v34  ;;  %v266_v26 = vshll.u32 %v263_v39, 16  ;;  %v284_v51 = vmul.u32 %v282_v14, %v258_v16  ;;  %v288_v52 = vshll.u32 %v285_v42, 16 }
  0xa6   :  { %v391_v54 = vshrl.u32 %v1680_v32, %v2145_v63  ;;  %v265_v55 = vmul.u32 %v261_v59, %v259_v27  ;;  %v268_v56 = vshll.u32 %v264_v3, 16  ;;  %v287_v58 = vmul.u32 %v283_v23, %v259_v27 }
  0xa7   :  { %v153_v29 = vadd.s32 536870912, %v152_v49  ;;  %vm270_vm1 = vc.u32 %v262_v36, %v266_v26  ;;  %v272_v12 = vadd.s32 %v266_v26, %v262_v36  ;;  %vm292_vm2 = vc.u32 %v284_v51, %v288_v52 }
  0xa8   :  { %v271_v62 = vsel %vm270_vm1, 1, %v1677_v0  ;;  %v290_v1 = vshll.u32 %v286_v48, 16  ;;  %v293_v9 = vsel %vm292_vm2, 1, %v1677_v0  ;;  %v294_v13 = vadd.s32 %v288_v52, %v284_v51 }
  0xa9   :  { %v154_v15 = vshrl.u32 %v153_v29, 30  ;;  %v273_v17 = vadd.s32 %v271_v62, %v265_v55  ;;  %vm274_vm3 = vc.u32 %v272_v12, %v268_v56  ;;  %v295_v5 = vadd.s32 %v293_v9, %v287_v58 }
  0xaa   :  { %v225_v25 = vshrl.u32 %v1683_v60, %v1916_v21  ;;  %v246_v23 = vsel %vm244_vm4, %v2107_v46, 2102212464  ;;  %v275_v27 = vsel %vm274_vm3, 1, %v1677_v0  ;;  %vm296_vm5 = vc.u32 %v294_v13, %v290_v1 }
  0xab   :  { %v155_v28 = vshll.u32 %v154_v15, 30  ;;  %v267_v14 = vshrl.u32 %v263_v39, 16  ;;  %v277_v16 = vadd.s32 %v275_v27, %v273_v17  ;;  %v297_v59 = vsel %vm296_vm5, 1, %v1677_v0 }
  0xac   :  { %v394_v53 = vshrl.u32 %v1678_v19, %v2145_v63  ;;  %v245_v34 = vsel %vm241_vm9, %v225_v25, %v2085_v6  ;;  %v289_v21 = vshrl.u32 %v285_v42, 16  ;;  %v299_v7 = vadd.s32 %v297_v59, %v295_v5 }
  0xad   :  { %vm56_vm6 = vcmp.lt.s32.totalorder %v1753_v10, 0  ;;  %v2175_v46 = vsub.s32 %v152_v49, %v155_v28  ;;  %v247_v39 = vsel %vm243_vm14, %v2104_v41, %v246_v23  ;;  %v269_v36 = vshrl.u32 %v264_v3, 16 }
  0xae   :  { %v278_v26 = vadd.s32 %v277_v16, %v267_v14  ;;  %vm399_vm4 = vcmp.lt.s32.totalorder %v2139_v38, 4  ;;  %v545_v19 = vshll.u32 %v1679_v30, %v1942_v35  ;;  %v291_v51 = vshrl.u32 %v286_v48, 16 }
  0xaf   :  { %v300_v52 = vadd.s32 %v299_v7, %v289_v21  ;;  %vm157_vm7 = vcmp.lt.s32.totalorder %v2175_v46, 0  ;;  %v158_v6 = vsub.s32 0, %v2175_v46  ;;  %v364_v49 = vand.u32 2147483647, %v1825_v44 }
  0xb0   :  { %v2185_v42 = vadd.s32 %v278_v26, %v269_v36  ;;  %v395_v55 = vor.u32 %v394_v53, %v2156_v4  ;;  %vm2191_vm8 = vcmp.le.f32.partialorder %v54_v43, 0.7853982  ;;  %v248_v3 = vsel %vm242_vm15, %v245_v34, %v247_v39 }
  0xb1   :  { %v2197_v48 = vadd.s32 %v294_v13, %v290_v1  ;;  %v301_v56 = vadd.s32 %v300_v52, %v291_v51  ;;  %v392_v58 = vor.u32 %v391_v54, %v390_v37  ;;  %v546_v29 = vshrl.u32 %v1680_v32, %v1982_v57 }
  0xb2   :  { %v159_v12 = vsel %vm157_vm7, %v158_v6, %v2175_v46  ;;  %v385_v4 = vshrl.u32 %v1682_v47, %v2145_v63  ;;  %v178_v43 = vsub.s32 4, %v154_v15  ;;  %v302_v50 = vmul.u32 %v2129_v18, %v248_v3 }
  0xb3   :  { %v160_v62 = vclz %v159_v12  ;;  %vm304_vm9 = vc.u32 %v2185_v42, %v2197_v48  ;;  %v305_v9 = vadd.s32 1, %v301_v56  ;;  %v371_v1 = vand.u32 8388607, %v364_v49 }
  0xb4   :  { %v384_v37 = vshll.u32 %v1681_v45, %v2081_v61  ;;  %v388_v32 = vshrl.u32 %v1679_v30, %v2145_v63  ;;  %v409_v54 = vsel %vm399_vm4, %v395_v55, 1326507024  ;;  %v387_v5 = vshll.u32 %v1682_v47, %v2081_v61 }
  0xb5   :  { %v1611_v13 = vadd.s32 4294967294, %v160_v62  ;;  %v306_v17 = vsel %vm304_vm9, %v305_v9, %v301_v56  ;;  %v148_v18 = vadd.s32 %v2133_v33, %v2131_v20  ;;  %v382_v23 = vshrl.u32 %v1681_v45, %v2145_v63 }
  0xb6   :  { %v307_v25 = vadd.s32 %v306_v17, %v302_v50  ;;  %v2221_v27 = vor.u32 %v385_v4, %v384_v37  ;;  %v179_v28 = vsel %vm56_vm6, %v178_v43, %v154_v15  ;;  %v381_v14 = vshll.u32 %v1683_v60, %v2081_v61 }
  0xb7   :  { %vm1612_vm10 = vcmp.lt.s32.totalorder %v1611_v13, 0  ;;  %v389_v16 = vor.u32 %v388_v32, %v387_v5  ;;  %v372_v34 = vor.u32 8388608, %v371_v1  ;;  %vm398_vm11 = vcmp.lt.s32.totalorder %v2139_v38, 3 }
  0xb8   :  { %v163_v59 = vsel %vm1612_vm10, 0, %v1611_v13  ;;  %v308_v53 = vadd.s32 536870912, %v307_v25  ;;  %vm396_vm12 = vcmp.lt.s32.totalorder %v2139_v38, 1  ;;  %v410_v21 = vsel %vm398_vm11, %v392_v58, %v409_v54 }
  0xb9   :  { %v164_v20 = vsub.s32 32, %v163_v59  ;;  %v168_v33 = vsub.s32 4294967266, %v163_v59  ;;  %v181_v7 = vsel %vm2191_vm8, 0, %v179_v28  ;;  %v383_v39 = vor.u32 %v382_v23, %v381_v14 }
  0xba   :  { %v309_v15 = vshrl.u32 %v308_v53, 30  ;;  %v408_v61 = vsel %vm396_vm12, %v2221_v27, %v389_v16  ;;  %v165_v36 = vshll.u32 %v2175_v46, %v163_v59  ;;  %vm211_vm13 = vcmp.lt.s32.totalorder %v1755_v11, 0 }
  0xbb   :  { %v166_v26 = vshrl.u32 %v148_v18, %v164_v20  ;;  %v169_v51 = vadd.s32 127, %v168_v33  ;;  %vm397_vm14 = vcmp.lt.s32.totalorder %v2139_v38, 2  ;;  %v405_v52 = vsel %vm399_vm4, %v392_v58, 920167782 }
  0xbc   :  { %v310_v6 = vshll.u32 %v309_v15, 30  ;;  %v411_v55 = vsel %vm397_vm14, %v408_v61, %v410_v21  ;;  %v2243_v3 = vshll.u32 %v372_v34, 8  ;;  %v2245_v56 = vor.u32 %v546_v29, %v545_v19 }
  0xbd   :  { %v167_v12 = vor.u32 %v166_v26, %v165_v36  ;;  %v170_v4 = vshll.u32 %v169_v51, 23  ;;  %v416_v46 = vshrl.u32 %v411_v55, 16  ;;  %v198_v43 = vadd.s32 3, %v181_v7 }
  0xbe   :  { %v2247_v62 = vsub.s32 %v307_v25, %v310_v6  ;;  %v380_v9 = vshrl.u32 %v1683_v60, %v2145_v63  ;;  %v415_v50 = vand.u32 65535, %v411_v55  ;;  %v404_v58 = vsel %vm396_vm12, %v383_v39, %v2221_v27 }
  0xbf   :  { %v171_v1 = vor.u32 4788187, %v170_v4  ;;  %v406_v37 = vsel %vm398_vm11, %v389_v16, %v405_v52  ;;  %v413_v19 = vand.u32 65535, %v2243_v3  ;;  %vm2259_vm15 = vcmp.le.f32.partialorder %v209_v24, 0.7853982 }
  0xc0   :  { %vm312_vm0 = vcmp.lt.s32.totalorder %v2247_v62, 0  ;;  %v313_v63 = vsub.s32 0, %v2247_v62  ;;  %v333_v32 = vsub.s32 4, %v309_v15  ;;  %v414_v54 = vshrl.u32 %v2243_v3, 16 }
  0xc1   :  { %v172_v13 = vand.u32 2147483647, %v171_v1  ;;  %v174_v17 = vcvt.s32.f32 %v167_v12  ;;  %v2266_v5 = vand.u32 3, %v181_v7  ;;  %v418_v18 = vmul.u32 %v416_v46, %v413_v19 }
  0xc2   :  { %v303_v25 = vadd.s32 %v2197_v48, %v2185_v42  ;;  %v314_v24 = vsel %vm312_vm0, %v313_v63, %v2247_v62  ;;  %v407_v23 = vsel %vm397_vm14, %v404_v58, %v406_v37  ;;  %v2273_v28 = vmul.u32 %v415_v50, %v414_v54 }
  0xc3   :  { %v175_v14 = vmul.f32 %v174_v17, %v172_v13  ;;  %v315_v59 = vclz %v314_v24  ;;  %v2275_v53 = vand.u32 3, %v198_v43  ;;  %v400_v34 = vsel %vm396_vm12, %v380_v9, %v383_v39 }
  0xc4   :  { %v334_v20 = vsel %vm211_vm13, %v333_v32, %v309_v15  ;;  %v401_v42 = vsel %vm399_vm4, %v389_v16, 2102212464  ;;  %v417_v48 = vmul.u32 %v415_v50, %v413_v19  ;;  %v421_v33 = vshll.u32 %v418_v18, 16 }
  0xc5   :  { %v176_v21 = vxor.u32 2147483648, %v175_v14  ;;  %v1614_v7 = vadd.s32 4294967294, %v315_v59  ;;  %v420_v61 = vmul.u32 %v416_v46, %v414_v54  ;;  %v437_v36 = vand.u32 65535, %v407_v23 }
  0xc6   :  { %v423_v26 = vshll.u32 %v2273_v28, 16  ;;  %vm425_vm1 = vc.u32 %v417_v48, %v421_v33  ;;  %v427_v51 = vadd.s32 %v421_v33, %v417_v48  ;;  %v438_v52 = vshrl.u32 %v407_v23, 16 }
  0xc7   :  { %v177_v39 = vsel %vm56_vm6, %v176_v21, %v175_v14  ;;  %vm1615_vm2 = vcmp.lt.s32.totalorder %v1614_v7, 0  ;;  %v402_v15 = vsel %vm398_vm11, %v2221_v27, %v401_v42  ;;  %v426_v16 = vsel %vm425_vm1, 1, %v1677_v0 }
  0xc8   :  { %v2293_v6 = vsel %vm2191_vm8, %v1753_v10, %v177_v39  ;;  %v318_v55 = vsel %vm1615_vm2, 0, %v1614_v7  ;;  %v428_v12 = vadd.s32 %v426_v16, %v420_v61  ;;  %vm429_vm3 = vc.u32 %v427_v51, %v423_v26 }
  0xc9   :  { %v182_v4 = vmul.f32 %v2293_v6, %v2293_v6  ;;  %v319_v46 = vsub.s32 32, %v318_v55  ;;  %v323_v43 = vsub.s32 4294967266, %v318_v55  ;;  %v2299_v9 = vsel %vm2259_vm15, 0, %v334_v20 }
  0xca   :  { %v320_v27 = vshll.u32 %v2247_v62, %v318_v55  ;;  %v430_v50 = vsel %vm429_vm3, 1, %v1677_v0  ;;  %v440_v1 = vmul.u32 %v438_v52, %v413_v19  ;;  %v441_v41 = vmul.u32 %v437_v36, %v414_v54 }
  0xcb   :  { %v183_v58 = vmul.f32 -0.001358992, %v182_v4  ;;  %v190_v37 = vmul.f32 -0.00019511016, %v182_v4  ;;  %v321_v63 = vshrl.u32 %v303_v25, %v319_v46  ;;  %v324_v32 = vadd.s32 127, %v323_v43 }
  0xcc   :  { %v422_v13 = vshrl.u32 %v418_v18, 16  ;;  %v432_v17 = vadd.s32 %v430_v50, %v428_v12  ;;  %v439_v24 = vmul.u32 %v437_v36, %v413_v19  ;;  %v443_v23 = vshll.u32 %v440_v1, 16 }
  0xcd   :  { %v184_v14 = vadd.f32 0.041655596, %v183_v58  ;;  %v191_v59 = vadd.f32 0.008332121, %v190_v37  ;;  %v322_v42 = vor.u32 %v321_v63, %v320_v27  ;;  %v325_v48 = vshll.u32 %v324_v32, 23 }
  0xce   :  { %v433_v20 = vadd.s32 %v432_v17, %v422_v13  ;;  %v445_v33 = vshll.u32 %v441_v41, 16  ;;  %vm447_vm5 = vc.u32 %v439_v24, %v443_v23  ;;  %v449_v62 = vadd.s32 %v443_v23, %v439_v24 }
  0xcf   :  { %v185_v21 = vmul.f32 %v184_v14, %v182_v4  ;;  %v192_v7 = vmul.f32 %v191_v59, %v182_v4  ;;  %v326_v61 = vor.u32 4788187, %v325_v48  ;;  %v442_v26 = vmul.u32 %v438_v52, %v414_v54 }
  0xd0   :  { %vm823_vm6 = vcmp.eq.s32.totalorder %v2266_v5, 2  ;;  %v329_v25 = vcvt.s32.f32 %v322_v42  ;;  %vm204_vm4 = vcmp.eq.s32.totalorder %v2275_v53, 2  ;;  %v424_v19 = vshrl.u32 %v2273_v28, 16 }
  0xd1   :  { %v448_v18 = vsel %vm447_vm5, 1, %v1677_v0  ;;  %vm451_vm7 = vc.u32 %v449_v62, %v445_v33  ;;  %v186_v36 = vadd.f32 -0.4999988, %v185_v21  ;;  %v193_v51 = vadd.f32 -0.16666654, %v192_v7 }
  0xd2   :  { %v327_v39 = vand.u32 2147483647, %v326_v61  ;;  %v450_v16 = vadd.s32 %v448_v18, %v442_v26  ;;  %vm820_vm8 = vcmp.eq.s32.totalorder %v2266_v5, 0  ;;  %vm201_vm9 = vcmp.eq.s32.totalorder %v2275_v53, 0 }
  0xd3   :  { %v403_v54 = vsel %vm397_vm14, %v400_v34, %v402_v15  ;;  %v2311_v52 = vadd.s32 %v433_v20, %v424_v19  ;;  %v444_v55 = vshrl.u32 %v440_v1, 16  ;;  %v452_v12 = vsel %vm451_vm7, 1, %v1677_v0 }
  0xd4   :  { %v187_v28 = vmul.f32 %v186_v36, %v182_v4  ;;  %v194_v46 = vmul.f32 %v193_v51, %v182_v4  ;;  %vm819_vm10 = vcmp.lt.s32.totalorder %v2266_v5, 2  ;;  %v330_v43 = vmul.f32 %v329_v25, %v327_v39 }
  0xd5   :  { %vm200_vm11 = vcmp.lt.s32.totalorder %v2275_v53, 2  ;;  %v454_v27 = vadd.s32 %v452_v12, %v450_v16  ;;  %vm197_vm12 = vweird.f32 %v1753_v10  ;;  %v353_v50 = vadd.s32 3, %v2299_v9 }
  0xd6   :  { %v446_v58 = vshrl.u32 %v441_v41, 16  ;;  %v2318_v38 = vadd.s32 %v449_v62, %v445_v33  ;;  %v519_v34 = vand.u32 2147483647, %v1816_v40  ;;  %vm554_vm14 = vcmp.lt.s32.totalorder %v2148_v31, 4 }
  0xd7   :  { %v188_v15 = vadd.f32 1.0, %v187_v28  ;;  %v195_v1 = vadd.f32 1.0, %v194_v46  ;;  %v331_v4 = vxor.u32 2147483648, %v330_v43  ;;  %v455_v37 = vadd.s32 %v454_v27, %v444_v55 }
  0xd8   :  { %v457_v63 = vmul.u32 %v2243_v3, %v403_v54  ;;  %vm459_vm0 = vc.u32 %v2311_v52, %v2318_v38  ;;  %v536_v32 = vshll.u32 %v1683_v60, %v1942_v35  ;;  %v537_v41 = vshrl.u32 %v1681_v45, %v1982_v57 }
  0xd9   :  { %v196_v13 = vmul.f32 %v195_v1, %v2293_v6  ;;  %v205_v17 = vxor.u32 2147483648, %v188_v15  ;;  %v332_v24 = vsel %vm211_vm13, %v331_v4, %v330_v43  ;;  %v456_v23 = vadd.s32 %v455_v37, %v446_v58 }
  0xda   :  { %v335_v3 = vsel %vm2259_vm15, %v1755_v11, %v332_v24  ;;  %v526_v14 = vand.u32 8388607, %v519_v34  ;;  %v2337_v59 = vor.u32 %v537_v41, %v536_v32  ;;  %v539_v42 = vshll.u32 %v1681_v45, %v1942_v35 }
  0xdb   :  { %v202_v48 = vxor.u32 2147483648, %v196_v13  ;;  %v825_v6 = vsel %vm823_vm6, %v205_v17, %v196_v13  ;;  %v337_v20 = vmul.f32 %v335_v3, %v335_v3  ;;  %v206_v33 = vsel %vm204_vm4, %v205_v17, %v196_v13 }
  0xdc   :  { %v460_v62 = vadd.s32 1, %v456_v23  ;;  %v540_v29 = vshrl.u32 %v1682_v47, %v1982_v57  ;;  %v542_v21 = vshll.u32 %v1682_v47, %v1942_v35  ;;  %v543_v7 = vshrl.u32 %v1679_v30, %v1982_v57 }
  0xdd   :  { %v822_v45 = vsel %vm820_vm8, %v188_v15, %v202_v48  ;;  %v338_v61 = vmul.f32 -0.001358992, %v337_v20  ;;  %v345_v26 = vmul.f32 -0.00019511016, %v337_v20  ;;  %v203_v25 = vsel %vm201_vm9, %v188_v15, %v202_v48 }
  0xde   :  { %v826_v19 = vsel %vm819_vm10, %v822_v45, %v825_v6  ;;  %v207_v18 = vsel %vm200_vm11, %v203_v25, %v206_v33  ;;  %v461_v35 = vsel %vm459_vm0, %v460_v62, %v456_v23  ;;  %v2362_v47 = vor.u32 %v540_v29, %v539_v42 }
  0xdf   :  { %v827_v30 = vsel %vm197_vm12, nan, %v826_v19  ;;  %v339_v36 = vadd.f32 0.041655596, %v338_v61  ;;  %v346_v51 = vadd.f32 0.008332121, %v345_v26  ;;  %v208_v39 = vsel %vm197_vm12, nan, %v207_v18 }
  0xe0   :  { %v560_v5 = vsel %vm554_vm14, %v2245_v56, 920167782  ;;  %v564_v53 = vsel %vm554_vm14, %v550_v22, 1326507024  ;;  %1370 = vmatmul.f32.vlgmr.msra.gmra.mxu0 %v827_v30  ;;  %1416 = vmatmul.f32.vlgmr.msra.gmra.mxu2 %v208_v39  ;;  %v462_v16 = vadd.s32 %v461_v35, %v457_v63  ;;  %v2376_v54 = vor.u32 %v543_v7, %v542_v21 }
  0xe1   :  { %v340_v55 = vmul.f32 %v339_v36, %v337_v20  ;;  %v347_v12 = vmul.f32 %v346_v51, %v337_v20  ;;  %v972_v10 = vand.u32 3, %v2299_v9  ;;  %v527_v28 = vor.u32 8388608, %v526_v14 }
  0xe2   :  { %v354_v46 = vand.u32 3, %v353_v50  ;;  %v463_v43 = vadd.s32 536870912, %v462_v16  ;;  %vm551_vm13 = vcmp.lt.s32.totalorder %v2148_v31, 1  ;;  %vm552_vm15 = vcmp.lt.s32.totalorder %v2148_v31, 2 }
  0xe3   :  { %v341_v2 = vadd.f32 -0.4999988, %v340_v55  ;;  %v348_v8 = vadd.f32 -0.16666654, %v347_v12  ;;  %vm553_vm1 = vcmp.lt.s32.totalorder %v2148_v31, 3  ;;  %v559_v22 = vsel %vm551_vm13, %v2337_v59, %v2362_v47 }
  0xe4   :  { %v2386_v27 = vshrl.u32 %v463_v43, 30  ;;  %v561_v9 = vsel %vm553_vm1, %v2376_v54, %v560_v5  ;;  %v563_v50 = vsel %vm551_vm13, %v2362_v47, %v2376_v54  ;;  %v565_v58 = vsel %vm553_vm1, %v2245_v56, %v564_v53 }
  0xe5   :  { %v342_v15 = vmul.f32 %v341_v2, %v337_v20  ;;  %v349_v1 = vmul.f32 %v348_v8, %v337_v20  ;;  %v566_v4 = vsel %vm552_vm15, %v563_v50, %v565_v58  ;;  %v2400_v37 = vshll.u32 %v527_v28, 8 }
  0xe6   :  { %vm352_vm2 = vweird.f32 %v1755_v11  ;;  %v465_v63 = vshll.u32 %v2386_v27, 30  ;;  %v571_v32 = vshrl.u32 %v566_v4, 16  ;;  %vm973_vm3 = vcmp.lt.s32.totalorder %v972_v10, 2 }
  0xe7   :  { %v343_v41 = vadd.f32 1.0, %v342_v15  ;;  %v350_v13 = vadd.f32 1.0, %v349_v1  ;;  %vm974_vm5 = vcmp.eq.s32.totalorder %v972_v10, 0  ;;  %v562_v56 = vsel %vm552_vm15, %v559_v22, %v561_v9 }
  0xe8   :  { %v2404_v17 = vsub.s32 %v462_v16, %v465_v63  ;;  %v568_v24 = vand.u32 65535, %v2400_v37  ;;  %v570_v23 = vand.u32 65535, %v566_v4  ;;  %vm977_vm6 = vcmp.eq.s32.totalorder %v972_v10, 2 }
  0xe9   :  { %v351_v14 = vmul.f32 %v350_v13, %v335_v3  ;;  %v360_v42 = vxor.u32 2147483648, %v343_v41  ;;  %vm355_vm4 = vcmp.lt.s32.totalorder %v354_v46, 2  ;;  %v569_v6 = vshrl.u32 %v2400_v37, 16 }
  0xea   :  { %vm467_vm7 = vcmp.lt.s32.totalorder %v2404_v17, 0  ;;  %v468_v48 = vsub.s32 0, %v2404_v17  ;;  %v573_v20 = vmul.u32 %v571_v32, %v568_v24  ;;  %vm356_vm8 = vcmp.eq.s32.totalorder %v354_v46, 0 }
  0xeb   :  { %v357_v33 = vxor.u32 2147483648, %v351_v14  ;;  %vm359_vm9 = vcmp.eq.s32.totalorder %v354_v46, 2  ;;  %v592_v62 = vand.u32 65535, %v562_v56  ;;  %v979_v29 = vsel %vm977_vm6, %v360_v42, %v351_v14 }
  0xec   :  { %v469_v21 = vsel %vm467_vm7, %v468_v48, %v2404_v17  ;;  %v574_v7 = vmul.u32 %v570_v23, %v569_v6  ;;  %v593_v45 = vshrl.u32 %v562_v56, 16  ;;  %v361_v26 = vsel %vm359_vm9, %v360_v42, %v351_v14 }
  0xed   :  { %v976_v3 = vsel %vm974_vm5, %v343_v41, %v357_v33  ;;  %v358_v61 = vsel %vm356_vm8, %v343_v41, %v357_v33  ;;  %v470_v25 = vclz %v469_v21  ;;  %v572_v35 = vmul.u32 %v570_v23, %v568_v24 }
  0xee   :  { %v980_v19 = vsel %vm973_vm3, %v976_v3, %v979_v29  ;;  %v362_v18 = vsel %vm355_vm4, %v358_v61, %v361_v26  ;;  %v576_v30 = vshll.u32 %v573_v20, 16  ;;  %v575_v5 = vmul.u32 %v571_v32, %v569_v6 }
  0xef   :  { %v981_v36 = vsel %vm352_vm2, nan, %v980_v19  ;;  %v363_v51 = vsel %vm352_vm2, nan, %v362_v18  ;;  %v1617_v39 = vadd.s32 4294967294, %v470_v25  ;;  %v578_v53 = vshll.u32 %v574_v7, 16 }
  0xf0   :  { %1393 = vmatmul.f32.vlgmr.msra.gmra.mxu1 %v981_v36  ;;  %1439 = vmatmul.f32.vlgmr.msra.gmra.mxu3 %v363_v51  ;;  %vm580_vm10 = vc.u32 %v572_v35, %v576_v30  ;;  %v582_v16 = vadd.s32 %v576_v30, %v572_v35  ;;  %v458_v55 = vadd.s32 %v2318_v38, %v2311_v52  ;;  %v577_v8 = vshrl.u32 %v573_v20, 16 }
  0xf1   :  { %vm1618_vm11 = vcmp.lt.s32.totalorder %v1617_v39, 0  ;;  %v581_v12 = vsel %vm580_vm10, 1, %v1677_v0  ;;  %v595_v10 = vmul.u32 %v593_v45, %v568_v24  ;;  %v596_v43 = vmul.u32 %v592_v62, %v569_v6 }
  0xf2   :  { %v473_v28 = vsel %vm1618_vm11, 0, %v1617_v39  ;;  %v583_v46 = vadd.s32 %v581_v12, %v575_v5  ;;  %vm584_vm12 = vc.u32 %v582_v16, %v578_v53  ;;  %v579_v9 = vshrl.u32 %v574_v7, 16 }
  0xf3   :  { %v474_v11 = vsub.s32 32, %v473_v28  ;;  %v478_v2 = vsub.s32 4294967266, %v473_v28  ;;  %v585_v22 = vsel %vm584_vm12, 1, %v1677_v0  ;;  %v594_v58 = vmul.u32 %v592_v62, %v568_v24 }
  0xf4   :  { %v587_v50 = vadd.s32 %v585_v22, %v583_v46  ;;  %v598_v15 = vshll.u32 %v595_v10, 16  ;;  %v475_v1 = vshll.u32 %v2404_v17, %v473_v28  ;;  %v597_v4 = vmul.u32 %v593_v45, %v569_v6 }
  0xf5   :  { %v476_v52 = vshrl.u32 %v458_v55, %v474_v11  ;;  %v479_v38 = vadd.s32 127, %v478_v2  ;;  %v600_v32 = vshll.u32 %v596_v43, 16  ;;  %v556_v23 = vsel %vm554_vm14, %v2376_v54, 2102212464 }
  0xf6   :  { %v588_v63 = vadd.s32 %v587_v50, %v577_v8  ;;  %vm602_vm0 = vc.u32 %v594_v58, %v598_v15  ;;  %v604_v41 = vadd.s32 %v598_v15, %v594_v58  ;;  %v535_v6 = vshrl.u32 %v1683_v60, %v1982_v57 }
  0xf7   :  { %v477_v13 = vor.u32 %v476_v52, %v475_v1  ;;  %v480_v56 = vshll.u32 %v479_v38, 23  ;;  %v603_v14 = vsel %vm602_vm0, 1, %v1677_v0  ;;  %v599_v33 = vshrl.u32 %v595_v10, 16 }
  0xf8   :  { %v589_v42 = vadd.s32 %v588_v63, %v579_v9  ;;  %v605_v24 = vadd.s32 %v603_v14, %v597_v4  ;;  %vm606_vm2 = vc.u32 %v604_v41, %v600_v32  ;;  %v608_v48 = vadd.s32 %v604_v41, %v600_v32 }
  0xf9   :  { %v481_v17 = vor.u32 4788187, %v480_v56  ;;  %v607_v20 = vsel %vm606_vm2, 1, %v1677_v0  ;;  %v484_v7 = vcvt.s32.f32 %v477_v13  ;;  %v555_v54 = vsel %vm551_vm13, %v535_v6, %v2337_v59 }
  0xfa   :  { %v609_v62 = vadd.s32 %v607_v20, %v605_v24  ;;  %v2432_v29 = vadd.s32 %v608_v48, %v589_v42  ;;  %vm614_vm3 = vc.u32 %v589_v42, %v608_v48  ;;  %v557_v45 = vsel %vm553_vm1, %v2362_v47, %v556_v23 }
  0xfb   :  { %v482_v21 = vand.u32 2147483647, %v481_v17  ;;  %v601_v3 = vshrl.u32 %v596_v43, 16  ;;  %v558_v0 = vsel %vm552_vm15, %v555_v54, %v557_v45  ;;  %vm366_vm14 = vcmp.lt.s32.totalorder %v1825_v44, 0 }
  0xfc   :  { %v610_v61 = vadd.s32 %v609_v62, %v599_v33  ;;  %vm2445_vm5 = vcmp.le.f32.partialorder %v364_v49, 0.7853982  ;;  %v612_v47 = vmul.u32 %v2400_v37, %v558_v0  ;;  %v488_v36 = vsub.s32 4, %v2386_v27 }
  0xfd   :  { %v485_v57 = vmul.f32 %v484_v7, %v482_v21  ;;  %vm507_vm15 = vweird.f32 %v1825_v44  ;;  %vm521_vm11 = vcmp.lt.s32.totalorder %v1816_v40, 0  ;;  %vm520_vm12 = vcmp.le.f32.partialorder %v519_v34, 0.7853982 }
  0xfe   :  { %v611_v60 = vadd.s32 %v610_v61, %v601_v3  ;;  %v489_v37 = vsel %vm366_vm14, %v488_v36, %v2386_v27 }
  0xff   :  { %v486_v26 = vxor.u32 2147483648, %v485_v57  ;;  %v491_v11 = vsel %vm2445_vm5, 0, %v489_v37 }
 0x100   :  { %v615_v25 = vadd.s32 1, %v611_v60  ;;  %v1126_v15 = vand.u32 3, %v491_v11  ;;  %v508_v4 = vadd.s32 3, %v491_v11 }
 0x101   :  { %v487_v59 = vsel %vm366_vm14, %v486_v26, %v485_v57 }
 0x102   :  { %v490_v31 = vsel %vm2445_vm5, %v1825_v44, %v487_v59  ;;  %v616_v18 = vsel %vm614_vm3, %v615_v25, %v611_v60  ;;  %vm1128_vm1 = vcmp.eq.s32.totalorder %v1126_v15, 0  ;;  %vm1131_vm6 = vcmp.eq.s32.totalorder %v1126_v15, 2 }
 0x103   :  { %v492_v35 = vmul.f32 %v490_v31, %v490_v31  ;;  %v617_v30 = vadd.s32 %v616_v18, %v612_v47  ;;  %vm1127_vm7 = vcmp.lt.s32.totalorder %v1126_v15, 2  ;;  %v509_v42 = vand.u32 3, %v508_v4  ;;  %v1658_v4 = vld [vmem:[%s2520_s4] ss:$0 sm:$0xff] }
 0x105   :  { %v493_v51 = vmul.f32 -0.001358992, %v492_v35  ;;  %v500_v49 = vmul.f32 -0.00019511016, %v492_v35  ;;  %v618_v39 = vadd.s32 536870912, %v617_v30  ;;  %vm511_vm8 = vcmp.eq.s32.totalorder %v509_v42, 0 }
 0x106   :  { %vm514_vm9 = vcmp.eq.s32.totalorder %v509_v42, 2  ;;  %vm510_vm10 = vcmp.lt.s32.totalorder %v509_v42, 2  ;;  %v1491_v42 = vld [vmem:[%s2522_s5 + $0x8] sm:$0xff] }
 0x107   :  { %v494_v5 = vadd.f32 0.041655596, %v493_v51  ;;  %v501_v53 = vadd.f32 0.008332121, %v500_v49  ;;  %v619_v16 = vshrl.u32 %v618_v39, 30 }
 0x109   :  { %v495_v55 = vmul.f32 %v494_v5, %v492_v35  ;;  %v502_v12 = vmul.f32 %v501_v53, %v492_v35  ;;  %v620_v10 = vshll.u32 %v619_v16, 30 }
 0x10b   :  { %v496_v28 = vadd.f32 -0.4999988, %v495_v55  ;;  %v503_v46 = vadd.f32 -0.16666654, %v502_v12  ;;  %v621_v43 = vsub.s32 %v617_v30, %v620_v10 }
 0x10d   :  { %v497_v2 = vmul.f32 %v496_v28, %v492_v35  ;;  %v504_v8 = vmul.f32 %v503_v46, %v492_v35  ;;  %vm622_vm13 = vcmp.lt.s32.totalorder %v621_v43, 0  ;;  %v623_v22 = vsub.s32 0, %v621_v43 }
 0x10f   :  { %v498_v9 = vadd.f32 1.0, %v497_v2  ;;  %v505_v50 = vadd.f32 1.0, %v504_v8  ;;  %v624_v58 = vsel %vm622_vm13, %v623_v22, %v621_v43 }
 0x110   :  { %v625_v1 = vclz %v624_v58 }
 0x111   :  { %v506_v52 = vmul.f32 %v505_v50, %v490_v31  ;;  %v515_v27 = vxor.u32 2147483648, %v498_v9 }
 0x112   :  { %v1620_v38 = vadd.s32 4294967294, %v625_v1 }
 0x113   :  { %v512_v63 = vxor.u32 2147483648, %v506_v52  ;;  %v1133_v41 = vsel %vm1131_vm6, %v515_v27, %v506_v52  ;;  %v516_v21 = vsel %vm514_vm9, %v515_v27, %v506_v52 }
 0x114   :  { %vm1621_vm4 = vcmp.lt.s32.totalorder %v1620_v38, 0 }
 0x115   :  { %v1130_v32 = vsel %vm1128_vm1, %v498_v9, %v512_v63  ;;  %v628_v13 = vsel %vm1621_vm4, 0, %v1620_v38  ;;  %v513_v62 = vsel %vm511_vm8, %v498_v9, %v512_v63 }
 0x116   :  { %v1134_v56 = vsel %vm1127_vm7, %v1130_v32, %v1133_v41  ;;  %v629_v23 = vsub.s32 32, %v628_v13  ;;  %v633_v14 = vsub.s32 4294967266, %v628_v13  ;;  %v630_v48 = vshll.u32 %v621_v43, %v628_v13 }
 0x117   :  { %v1135_v24 = vsel %vm507_vm15, nan, %v1134_v56  ;;  %v517_v54 = vsel %vm510_vm10, %v513_v62, %v516_v21  ;;  %v1493_v56 = vld [vmem:[%s2522_s5 + $0x18] sm:$0xff]  ;;  %vm1498_vm7 = vcmask 261120  }
 0x118   :  { %1373 = vmatmul.f32.gmra.mxu0 %v1135_v24  ;;  %v631_v17 = vshrl.u32 %v2432_v29, %v629_v23  ;;  %v634_v6 = vadd.s32 127, %v633_v14  ;;  %v518_v45 = vsel %vm507_vm15, nan, %v517_v54  ;;  %v643_v29 = vsub.s32 4, %v619_v16  ;;  %v1492_v23 = vld [vmem:[%s2522_s5 + $0x10] sm:$0xff]  ;;  %1642 = vmatpush.msrb.mxu2 %v1493_v56 }
 0x119   :  { %1419 = vmatmul.f32.gmra.mxu2 %v518_v45  ;;  %vm662_vm15 = vweird.f32 %v1816_v40  ;;  %1517 = vmatpush.msrb.mxu0 %v1493_v56 }
 0x11a   :  { %v632_v20 = vor.u32 %v631_v17, %v630_v48  ;;  %v635_v33 = vshll.u32 %v634_v6, 23  ;;  %v644_v19 = vsel %vm521_vm11, %v643_v29, %v619_v16  ;;  %1643 = vmatpush.msrb.mxu2 %v1492_v23  ;;  %v1490_v17 = vld [vmem:[%s2522_s5] sm:$0xff] }
 0x11b   :  { %v646_v44 = vsel %vm520_vm12, 0, %v644_v19  ;;  %1518 = vmatpush.msrb.mxu0 %v1492_v23 }
 0x11c   :  { %v636_v7 = vor.u32 4788187, %v635_v33  ;;  %v639_v61 = vcvt.s32.f32 %v632_v20  ;;  %v663_v36 = vadd.s32 3, %v646_v44  ;;  %v1280_v53 = vand.u32 3, %v646_v44  ;;  %1644 = vmatpush.msrb.mxu2 %v1491_v42 }
 0x11d   :  { %1519 = vmatpush.msrb.mxu0 %v1491_v42 }
 0x11e   :  { %v637_v3 = vand.u32 2147483647, %v636_v7  ;;  %v664_v37 = vand.u32 3, %v663_v36  ;;  %vm1285_vm0 = vcmp.eq.s32.totalorder %v1280_v53, 2  ;;  %vm1282_vm3 = vcmp.eq.s32.totalorder %v1280_v53, 0  ;;  %1645 = vmatpush.msrb.mxu2 %v1490_v17 }
 0x11f   :  { %vm1281_vm5 = vcmp.lt.s32.totalorder %v1280_v53, 2  ;;  %1520 = vmatpush.msrb.mxu0 %v1490_v17 }
 0x120   :  { %v640_v57 = vmul.f32 %v639_v61, %v637_v3  ;;  %vm669_vm2 = vcmp.eq.s32.totalorder %v664_v37, 2  ;;  %vm666_vm14 = vcmp.eq.s32.totalorder %v664_v37, 0  ;;  %vm665_vm13 = vcmp.lt.s32.totalorder %v664_v37, 2 }
 0x122   :  { %v641_v0 = vxor.u32 2147483648, %v640_v57 }
 0x124   :  { %v642_v60 = vsel %vm521_vm11, %v641_v0, %v640_v57 }
 0x125   :  { %v645_v26 = vsel %vm520_vm12, %v1816_v40, %v642_v60 }
 0x126   :  { %v647_v25 = vmul.f32 %v645_v26, %v645_v26 }
 0x128   :  { %v648_v59 = vmul.f32 -0.001358992, %v647_v25  ;;  %v655_v47 = vmul.f32 -0.00019511016, %v647_v25 }
 0x12a   :  { %v649_v31 = vadd.f32 0.041655596, %v648_v59  ;;  %v656_v18 = vadd.f32 0.008332121, %v655_v47 }
 0x12c   :  { %v650_v35 = vmul.f32 %v649_v31, %v647_v25  ;;  %v657_v30 = vmul.f32 %v656_v18, %v647_v25 }
 0x12e   :  { %v651_v51 = vadd.f32 -0.4999988, %v650_v35  ;;  %v658_v49 = vadd.f32 -0.16666654, %v657_v30 }
 0x130   :  { %v652_v39 = vmul.f32 %v651_v51, %v647_v25  ;;  %v659_v5 = vmul.f32 %v658_v49, %v647_v25 }
 0x132   :  { %v653_v34 = vadd.f32 1.0, %v652_v39  ;;  %v660_v55 = vadd.f32 1.0, %v659_v5  ;;  %v1659_v39 = vld [vmem:[%s2521_s6] ss:$0 sm:$0xff] }
 0x134   :  { %v661_v12 = vmul.f32 %v660_v55, %v645_v26  ;;  %v670_v10 = vxor.u32 2147483648, %v653_v34 }
 0x136   :  { %v667_v16 = vxor.u32 2147483648, %v661_v12  ;;  %v1287_v28 = vsel %vm1285_vm0, %v670_v10, %v661_v12  ;;  %v671_v46 = vsel %vm669_vm2, %v670_v10, %v661_v12  ;;  %v1569_v10 = vld [vmem:[%s2524_s7 + $0x18] sm:$0xff] }
 0x137   :  { %1592 = vmatpush.msrb.mxu1 %v1569_v10  ;;  %1646 = vmatpush.msrb.mxu3 %v1569_v10 }
 0x138   :  { %v1284_v43 = vsel %vm1282_vm3, %v653_v34, %v667_v16  ;;  %v668_v11 = vsel %vm666_vm14, %v653_v34, %v667_v16  ;;  %v1568_v16 = vld [vmem:[%s2524_s7 + $0x10] sm:$0xff] }
 0x139   :  { %v1288_v2 = vsel %vm1281_vm5, %v1284_v43, %v1287_v28  ;;  %v672_v8 = vsel %vm665_vm13, %v668_v11, %v671_v46  ;;  %v1567_v46 = vld [vmem:[%s2524_s7 + $0x8] sm:$0xff]  ;;  %1593 = vmatpush.msrb.mxu1 %v1568_v16  ;;  %1647 = vmatpush.msrb.mxu3 %v1568_v16 }
 0x13a   :  { %v1289_v22 = vsel %vm662_vm15, nan, %v1288_v2  ;;  %v673_v9 = vsel %vm662_vm15, nan, %v672_v8  ;;  %v1566_v2 = vld [vmem:[%s2524_s7] sm:$0xff] }
 0x13b   :  { %1396 = vmatmul.f32.gmra.mxu1 %v1289_v22  ;;  %1442 = vmatmul.f32.gmra.mxu3 %v673_v9 }
 0x13c   :  { %1594 = vmatpush.msrb.mxu1 %v1567_v46  ;;  %1648 = vmatpush.msrb.mxu3 %v1567_v46 }
 0x13e   :  { %1595 = vmatpush.msrb.mxu1 %v1566_v2  ;;  %1649 = vmatpush.msrb.mxu3 %v1566_v2 }
 0x15d   :  { %v1371_v50 = vpop.f32.mrf.mxu0 }
 0x163   :  { %v1417_v15 = vpop.f32.mrf.mxu2 }
 0x16d   :  { %v1394_v58 = vpop.f32.mrf.mxu1 }
 0x16e   :  { %v1395_v1 = vadd.f32 %v1394_v58, %v1371_v50 }
 0x170   :  { %v1418_v52 = vadd.f32 %v1417_v15, %v1395_v1 }
 0x173   :  { %v1440_v27 = vpop.f32.mrf.mxu3 }
 0x174   :  { %v1441_v38 = vadd.f32 %v1440_v27, %v1418_v52 }
 0x176   :  { %v1450_v63 = vadd.f32 %v1658_v4, %v1441_v38 }
 0x178   :  { %v1634_v32 = vmul.f32 -1.442695, %v1450_v63 }
 0x17a   :  { %1661 = vpow2.f32 %v1634_v32 }
 0x180   :  { %v1662_v40 = vpop.eup %1661 }
 0x181   :  { %v1458_v41 = vadd.f32 1.0, %v1662_v40 }
 0x183   :  { %1663 = vrcp.f32 %v1458_v41  ;;  %v1471_v48 = vand.u32 2147483648, %v1458_v41  ;;  %v1469_v20 = vand.u32 2147483647, %v1458_v41  ;;  %vm1465_vm6 = vweird.f32 %v1458_v41 }
 0x185   :  { %v1472_v62 = vor.u32 1.1754944e-38, %v1471_v48  ;;  %vm1470_vm8 = vcmp.eq.f32.partialorder %v1469_v20, 8.507059e+37  ;;  %v1660_v48 = vld [vmem:[%s2523_s8] ss:$0 sm:$0xff] }
 0x189   :  { %v1664_v13 = vpop.eup %1663 }
 0x18a   :  { %v1461_v14 = vmul.f32 %v1664_v13, %v1458_v41  ;;  %vm1466_vm1 = vweird.f32 %v1664_v13 }
 0x18b   :  { %vm1467_vm4 = vmor %vm1465_vm6, %vm1466_vm1  ;;  %vm1603_vm6 = vcmask 31744  }
 0x18c   :  { %v1462_v24 = vsub.f32 1.0, %v1461_v14 }
 0x18e   :  { %v1463_v6 = vmul.f32 %v1664_v13, %v1462_v24 }
 0x190   :  { %v1464_v33 = vadd.f32 %v1664_v13, %v1463_v6 }
 0x192   :  { %v1468_v7 = vsel %vm1467_vm4, %v1664_v13, %v1464_v33 }
 0x193   :  { %v1473_v54 = vsel %vm1470_vm8, %v1472_v62, %v1468_v7 }
 0x194   :  { %1636 = vmatmul.msk.f32.vlgmr.msrb.gmra.mxu0 %vm1498_vm7, %v1473_v54 }
 0x195   :  { %v1374_v21 = vpop.f32.mrf.mxu0 }
 0x19c   :  { %v1420_v3 = vpop.f32.mrf.mxu2 }
 0x1b8   :  { %v1397_v45 = vpop.f32.mrf.mxu1 }
 0x1b9   :  { %v1398_v61 = vadd.f32 %v1397_v45, %v1374_v21 }
 0x1bb   :  { %v1421_v57 = vadd.f32 %v1420_v3, %v1398_v61 }
 0x1be   :  { %v1443_v0 = vpop.f32.mrf.mxu3 }
 0x1bf   :  { %v1444_v29 = vadd.f32 %v1443_v0, %v1421_v57 }
 0x1c1   :  { %v1451_v60 = vadd.f32 %v1658_v4, %v1444_v29 }
 0x1c3   :  { %v1635_v26 = vmul.f32 -1.442695, %v1451_v60 }
 0x1c5   :  { %1665 = vpow2.f32 %v1635_v26 }
 0x1cb   :  { %v1666_v25 = vpop.eup %1665 }
 0x1cc   :  { %v1459_v19 = vadd.f32 1.0, %v1666_v25 }
 0x1ce   :  { %1667 = vrcp.f32 %v1459_v19  ;;  %v1486_v31 = vand.u32 2147483648, %v1459_v19  ;;  %v1484_v35 = vand.u32 2147483647, %v1459_v19  ;;  %vm1480_vm10 = vweird.f32 %v1459_v19 }
 0x1d0   :  { %v1487_v36 = vor.u32 1.1754944e-38, %v1486_v31  ;;  %vm1485_vm12 = vcmp.eq.f32.partialorder %v1484_v35, 8.507059e+37 }
 0x1d4   :  { %v1668_v59 = vpop.eup %1667 }
 0x1d5   :  { %v1476_v47 = vmul.f32 %v1668_v59, %v1459_v19  ;;  %vm1481_vm9 = vweird.f32 %v1668_v59 }
 0x1d6   :  { %vm1482_vm11 = vmor %vm1480_vm10, %vm1481_vm9 }
 0x1d7   :  { %v1477_v44 = vsub.f32 1.0, %v1476_v47 }
 0x1d9   :  { %v1478_v18 = vmul.f32 %v1668_v59, %v1477_v44 }
 0x1db   :  { %v1479_v30 = vadd.f32 %v1668_v59, %v1478_v18 }
 0x1dd   :  { %v1483_v51 = vsel %vm1482_vm11, %v1668_v59, %v1479_v30 }
 0x1de   :  { %v1488_v49 = vsel %vm1485_vm12, %v1487_v36, %v1483_v51 }
 0x1df   :  { %1637 = vmatmul.msk.f32.vlgmr.msrb.gmra.mxu2 %vm1498_vm7, %v1488_v49 }
 0x211   :  { %v1522_v5 = vpop.f32.mrf.mxu0 }
 0x212   :  { %v1523_v53 = vadd.f32 %v1659_v39, %v1522_v5 }
 0x214   :  { %v1638_v37 = vmul.f32 -1.442695, %v1523_v53 }
 0x216   :  { %1669 = vpow2.f32 %v1638_v37 }
 0x21c   :  { %v1670_v34 = vpop.eup %1669 }
 0x21d   :  { %v1534_v55 = vadd.f32 1.0, %v1670_v34 }
 0x21f   :  { %1671 = vrcp.f32 %v1534_v55  ;;  %v1547_v11 = vand.u32 2147483648, %v1534_v55  ;;  %v1545_v22 = vand.u32 2147483647, %v1534_v55  ;;  %vm1541_vm2 = vweird.f32 %v1534_v55 }
 0x221   :  { %v1548_v50 = vor.u32 1.1754944e-38, %v1547_v11  ;;  %vm1546_vm14 = vcmp.eq.f32.partialorder %v1545_v22, 8.507059e+37 }
 0x225   :  { %v1672_v12 = vpop.eup %1671 }
 0x226   :  { %v1537_v28 = vmul.f32 %v1672_v12, %v1534_v55  ;;  %vm1542_vm0 = vweird.f32 %v1672_v12 }
 0x227   :  { %vm1543_vm3 = vmor %vm1541_vm2, %vm1542_vm0 }
 0x228   :  { %v1538_v43 = vsub.f32 1.0, %v1537_v28 }
 0x22a   :  { %v1539_v8 = vmul.f32 %v1672_v12, %v1538_v43 }
 0x22c   :  { %v1540_v9 = vadd.f32 %v1672_v12, %v1539_v8 }
 0x22e   :  { %v1544_v58 = vsel %vm1543_vm3, %v1672_v12, %v1540_v9 }
 0x22f   :  { %v1549_v15 = vsel %vm1546_vm14, %v1548_v50, %v1544_v58 }
 0x230   :  { %1640 = vmatmul.msk.f32.vlgmr.msrb.gmra.mxu1 %vm1498_vm7, %v1549_v15 }
 0x262   :  { %v1525_v1 = vpop.f32.mrf.mxu2 }
 0x263   :  { %v1526_v52 = vadd.f32 %v1659_v39, %v1525_v1 }
 0x265   :  { %v1639_v27 = vmul.f32 -1.442695, %v1526_v52 }
 0x267   :  { %1673 = vpow2.f32 %v1639_v27 }
 0x26d   :  { %v1674_v38 = vpop.eup %1673 }
 0x26e   :  { %v1535_v4 = vadd.f32 1.0, %v1674_v38 }
 0x270   :  { %1675 = vrcp.f32 %v1535_v4  ;;  %v1562_v41 = vand.u32 2147483648, %v1535_v4  ;;  %v1560_v56 = vand.u32 2147483647, %v1535_v4  ;;  %vm1556_vm13 = vweird.f32 %v1535_v4 }
 0x272   :  { %v1563_v14 = vor.u32 1.1754944e-38, %v1562_v41  ;;  %vm1561_vm1 = vcmp.eq.f32.partialorder %v1560_v56, 8.507059e+37 }
 0x276   :  { %v1676_v63 = vpop.eup %1675 }
 0x277   :  { %v1552_v32 = vmul.f32 %v1676_v63, %v1535_v4  ;;  %vm1557_vm5 = vweird.f32 %v1676_v63 }
 0x278   :  { %vm1558_vm15 = vmor %vm1556_vm13, %vm1557_vm5 }
 0x279   :  { %v1553_v40 = vsub.f32 1.0, %v1552_v32 }
 0x27b   :  { %v1554_v13 = vmul.f32 %v1676_v63, %v1553_v40 }
 0x27d   :  { %v1555_v23 = vadd.f32 %v1676_v63, %v1554_v13 }
 0x27f   :  { %v1559_v42 = vsel %vm1558_vm15, %v1676_v63, %v1555_v23 }
 0x280   :  { %v1564_v24 = vsel %vm1561_vm1, %v1563_v14, %v1559_v42 }
 0x281   :  { %1641 = vmatmul.msk.f32.vlgmr.msrb.gmra.mxu3 %vm1498_vm7, %v1564_v24 }
 0x2ad   :  { %v1597_v17 = vpop.f32.mrf.mxu1 }
 0x2ae   :  { %v1598_v6 = vadd.f32 %v1660_v48, %v1597_v17 }
 0x2b0   :  { %1604 = vst.msk [vmem:[%s2525_s9] sm:$0xff] %vm1603_vm6, %v1598_v6 }
 0x304   :  { %v1600_v20 = vpop.f32.mrf.mxu3 }
 0x305   :  { %v1601_v33 = vadd.f32 %v1660_v48, %v1600_v20 }
 0x307   :  { %1605 = vst.msk [vmem:[%s2525_s9 + $0x8] sm:$0xff] %vm1603_vm6, %v1601_v33 }

</bundles_post_ra>
